<compile_context>
chip_gen: v7x
topology: tpu7x:2x2x1
jax: 0.10.0
libtpu: 0.0.40
codegen_flags: <defaults>
</compile_context>

<pallas_src>
import jax
import jax.numpy as jnp
from jax import lax
from jax.experimental import pallas as pl
from jax.experimental.pallas import tpu as pltpu


def _embed_kernel(x_ref, w_ref, add_ref, o_ref):
    # x_ref:   (TB, C, P)  batch block; pixel axis pre-padded with a zero column
    #                       at position 0 (the cls slot), channels-major NCHW view
    # w_ref:   (C, E)      1x1-conv weight, (in, out)
    # add_ref: (P, E)      pos + [cls ; bias * ones]   (batch-invariant)
    # o_ref:   (TB, P, E)
    proj = lax.dot_general(
        x_ref[...], w_ref[...],
        dimension_numbers=(((1,), (0,)), ((), ())),
        preferred_element_type=jnp.float32)                 # (TB, P, E)
    o_ref[...] = (proj + add_ref[...][None, :, :]).astype(o_ref.dtype)


def embedding_forward(x, conv_weight, conv_bias, cls, pos):
    """x: (B, C, H, W) NCHW; conv_weight: (E, C, 1, 1); conv_bias: (E,);
    cls: (1, 1, E); pos: (1, P, E) with P == 1 + H*W. Returns (B, P, E)."""
    B, C, H, W = x.shape
    E = conv_weight.shape[0]
    P = pos.shape[1]
    HW = H * W
    assert P == HW + 1, "patches must equal 1 + H*W"

    # Free contiguous view of NCHW, then pad ONE leading zero pixel column so the
    # matmul emits the (zero) cls row directly — no in-kernel concat/relayout.
    x_cp = jnp.pad(x.reshape(B, C, HW), ((0, 0), (0, 0), (1, 0))).astype(x.dtype)

    # Batch-invariant pieces, computed once outside the kernel.
    w_ce = conv_weight.reshape(E, C).T.astype(x.dtype)           # (C, E)
    addend = (pos.reshape(P, E) + jnp.concatenate(
        [cls.reshape(1, E),
         jnp.broadcast_to(conv_bias.reshape(1, E), (HW, E))],
        axis=0)).astype(jnp.float32)                             # (P, E)

    # Block selection: at these tiny shapes a single grid step (tb = B) wins —
    # each extra step costs ~0.35 us of fixed overhead.  For large B, cap the
    # per-block footprint (~2 MiB, double-buffered well under the 32 MiB scoped
    # VMEM default on v7x) which also restores DMA/compute pipelining.
    itemsize = jnp.dtype(x.dtype).itemsize
    bytes_per_batch = (C * P + P * E) * itemsize                 # x block + out block
    target_block_bytes = 2 << 20
    tb = max(1, min(B, target_block_bytes // max(bytes_per_batch, 1)))
    while B % tb != 0:                                           # keep an even split
        tb -= 1
    grid = (B // tb,)

    cost = pl.CostEstimate(
        flops=2 * B * P * C * E,
        transcendentals=0,
        bytes_accessed=(x_cp.size + w_ce.size + addend.size + B * P * E) * itemsize,
    )

    out = pl.pallas_call(
        _embed_kernel,
        out_shape=jax.ShapeDtypeStruct((B, P, E), x.dtype),
        grid_spec=pltpu.PrefetchScalarGridSpec(
            num_scalar_prefetch=0,
            grid=grid,
            in_specs=[
                pl.BlockSpec((tb, C, P), lambda i: (i, 0, 0)),   # per-block batches
                pl.BlockSpec((C, E), lambda i: (0, 0)),          # weight (shared)
                pl.BlockSpec((P, E), lambda i: (0, 0)),          # pos + cls/bias
            ],
            out_specs=pl.BlockSpec((tb, P, E), lambda i: (i, 0, 0)),
        ),
        compiler_params=pltpu.CompilerParams(
            dimension_semantics=("parallel",)),
        cost_estimate=cost,
    )(x_cp, w_ce, addend)
    return out


def embedding_reference(x, conv_weight, conv_bias, cls, pos):
    B, C, H, W = x.shape
    E = conv_weight.shape[0]
    x_flat = jnp.transpose(x, (0, 2, 3, 1)).reshape(B, H * W, C)
    proj = x_flat @ conv_weight.reshape(E, C).T + conv_bias[None, None, :]
    cls_b = jnp.broadcast_to(cls, (B, 1, E))
    return jnp.concatenate([cls_b, proj], axis=1) + pos


if __name__ == "__main__":
    # Shapes implied by the module: sudoku board 9x9, 9 input channels,
    # patches = 82 = 1 cls + 81 cells, latent_vector_size = 32.
    B, C, H, W = 2, 9, 9, 9
    E = 32            # latent_vector_size
    P = 1 + H * W     # 82 patches

    key = jax.random.PRNGKey(0)
    kx, kw, kb, kc, kp = jax.random.split(key, 5)
    x = jax.random.normal(kx, (B, C, H, W), dtype=jnp.float32)
    conv_weight = jax.random.normal(kw, (E, C, 1, 1), dtype=jnp.float32) * 0.1
    conv_bias = jax.random.normal(kb, (E,), dtype=jnp.float32) * 0.1
    cls = jax.random.normal(kc, (1, 1, E), dtype=jnp.float32)
    pos = jax.random.normal(kp, (1, P, E), dtype=jnp.float32)

    out = embedding_forward(x, conv_weight, conv_bias, cls, pos)
    out = jax.block_until_ready(out)

    ref = embedding_reference(x, conv_weight, conv_bias, cls, pos)
    assert out.shape == (B, P, E), out.shape
    assert jnp.allclose(out, ref, atol=1e-3, rtol=1e-3), "mismatch vs reference"

    print("KERNEL_OK")
</pallas_src>

<mosaic_0001>
module attributes {stable_mosaic.version = 11 : i64} {
  func.func @_embed_kernel(%arg0: i32, %arg1: memref<2x9x82xf32, #tpu.memory_space<vmem>>, %arg2: memref<9x32xf32, #tpu.memory_space<vmem>>, %arg3: memref<82x32xf32, #tpu.memory_space<vmem>>, %arg4: memref<2x82x32xf32, #tpu.memory_space<vmem>>) attributes {dimension_semantics = [#tpu.dimension_semantics<parallel>], iteration_bounds = array<i64: 1>, scalar_prefetch = 0 : i64, scratch_operands = 0 : i64, tpu.core_type = #tpu.core_type<tc>, window_params = [{transform_indices = @transform_0, window_bounds = array<i64: 2, 9, 82>}, {pipeline_mode = #tpu.pipeline_mode<synchronous>, transform_indices = @transform_1, window_bounds = array<i64: 9, 32>}, {pipeline_mode = #tpu.pipeline_mode<synchronous>, transform_indices = @transform_2, window_bounds = array<i64: 82, 32>}, {transform_indices = @transform_3, window_bounds = array<i64: 2, 82, 32>}]} {
    %c0 = arith.constant 0 : index
    %c0_0 = arith.constant 0 : index
    %c0_1 = arith.constant 0 : index
    %0 = vector.load %arg1[%c0, %c0_0, %c0_1] : memref<2x9x82xf32, #tpu.memory_space<vmem>>, vector<2x9x82xf32>
    %c0_2 = arith.constant 0 : index
    %c0_3 = arith.constant 0 : index
    %1 = vector.load %arg2[%c0_2, %c0_3] : memref<9x32xf32, #tpu.memory_space<vmem>>, vector<9x32xf32>
    %cst = arith.constant dense<0.000000e+00> : vector<2x82x32xf32>
    %2 = tpu.matmul %0, %1, %cst {dimension_numbers = #tpu.dot_dimension_numbers<[1], [0], [0, 2], [1], [0, 0, 0, 2, 1, 1], [], []>} : vector<2x9x82xf32>, vector<9x32xf32>, vector<2x82x32xf32> -> vector<2x82x32xf32>
    %c0_4 = arith.constant 0 : index
    %c0_5 = arith.constant 0 : index
    %3 = vector.load %arg3[%c0_4, %c0_5] : memref<82x32xf32, #tpu.memory_space<vmem>>, vector<82x32xf32>
    %4 = vector.shape_cast %3 : vector<82x32xf32> to vector<1x82x32xf32>
    %5 = vector.broadcast %4 : vector<1x82x32xf32> to vector<2x82x32xf32>
    %6 = arith.addf %2, %5 : vector<2x82x32xf32>
    %c0_6 = arith.constant 0 : index
    %c0_7 = arith.constant 0 : index
    %c0_8 = arith.constant 0 : index
    %7 = vector.load %arg4[%c0_6, %c0_7, %c0_8] : memref<2x82x32xf32, #tpu.memory_space<vmem>>, vector<2x82x32xf32>
    tpu.vector_store %arg4[%c0_6, %c0_7, %c0_8], %6 {strides = array<i32>} : memref<2x82x32xf32, #tpu.memory_space<vmem>>, vector<2x82x32xf32>,
    return
  }
  func.func @transform_0(%arg0: i32) -> (i32, i32, i32) {
    %c0_i32 = arith.constant 0 : i32
    %c0_i32_0 = arith.constant 0 : i32
    %c0_i32_1 = arith.constant 0 : i32
    return %arg0, %c0_i32, %c0_i32_0 : i32, i32, i32
  }
  func.func @transform_1(%arg0: i32) -> (i32, i32) {
    %c0_i32 = arith.constant 0 : i32
    %c0_i32_0 = arith.constant 0 : i32
    %c0_i32_1 = arith.constant 0 : i32
    return %c0_i32, %c0_i32_0 : i32, i32
  }
  func.func @transform_2(%arg0: i32) -> (i32, i32) {
    %c0_i32 = arith.constant 0 : i32
    %c0_i32_0 = arith.constant 0 : i32
    %c0_i32_1 = arith.constant 0 : i32
    return %c0_i32, %c0_i32_0 : i32, i32
  }
  func.func @transform_3(%arg0: i32) -> (i32, i32, i32) {
    %c0_i32 = arith.constant 0 : i32
    %c0_i32_0 = arith.constant 0 : i32
    %c0_i32_1 = arith.constant 0 : i32
    return %arg0, %c0_i32, %c0_i32_0 : i32, i32, i32
  }
}

</mosaic_0001>

<bundles_post_ra>
// kernel: tpu_custom_call.1
= control target key start
LH: loop header
LB: loop body
LE: loop exit
PB: predicated region body
PF: predicated region fallthrough
CT: control target
= control target key end

     0   :  { %v2500_v6 = vmov 0.0|0.0   ;;  %vm1419_vm0 = vcmask 1040384   ;;  %vm2501_vm1 = vmmov 1   ;;  %vm2502_vm3 = vmmov 0   ;;  %s3207_s0 = inlined_call_operand.vmem [shape: f32[2,9,82], index: 0, kind: input, shape index: {}]   ;;  %s3208_s1 = inlined_call_operand.vmem [shape: f32[9,32], index: 1, kind: input, shape index: {}]   ;;  %s3209_s2 = inlined_call_operand.vmem [shape: f32[82,32], index: 2, kind: input, shape index: {}]   ;;  %s3210_s3 = inlined_call_operand.vmem [shape: f32[2,82,32], index: 3, kind: output, shape index: {}]  }
   0x1   :  { %v14_v0 = vld [vmem:[%s3207_s0] sm:$0xff]  ;;  %v16_v1 = vld [vmem:[%s3207_s0 + $0x10] sm:$0xff]  ;;  %v15_v2 = vld [vmem:[%s3207_s0 + $0x8] sm:$0x1]  ;;  %2479 = vmatprep.subr.bf16.mxu0 %v2500_v6  ;;  %2483 = vmatprep.subr.bf16.mxu1 %v2500_v6  ;;  %v2503_v8 = vmov 0.0   ;;  %v121_v11 = vlaneseq  ;;  %vm1376_vm4 = vcmask 72704  }
   0x2   :  { %31 = vxpose.xlu0.b32.start [1/2] (short) (narrow) %v14_v0, 88  ;;  %63 = vxpose.xlu1.b32.start [1/2] (short) (narrow) %v16_v1, 88  ;;  %v17_v3 = vld [vmem:[%s3207_s0 + $0x18] sm:$0x1]  ;;  %v18_v4 = vld [vmem:[%s3208_s1] sm:$0xff]  ;;  %vm2481_vm2 = vmpackc.low %vm1419_vm0, %vm2501_vm1  ;;  %vm2338_vm5 = vcmask 261120  }
   0x3   :  { %v19_v5 = vld [vmem:[%s3208_s1 + $0x8] sm:$0x1]  ;;  %2416 = vmatprep.mubr.msk.f32.mxu0 %vm2502_vm3, %v2503_v8  ;;  %2449 = vmatprep.mubr.msk.f32.mxu1 %vm2502_vm3, %v2503_v8  ;;  %v2504_v9 = vmov 1983009808   ;;  %v122_v13 = vshrl.u32 %v121_v11, 7  ;;  %vm2349_vm6 = vcmask 254976  }
   0x4   :  { %v2480_v7 = vpack.c.bf16 %v19_v5, %v18_v4  ;;  %v119_v10 = vunpack.c.l.s4 %v2504_v9 }
   0x6   :  { %32 = vxpose.xlu0.b32.end [2/2] (short) (narrow) %v15_v2, 88  ;;  %64 = vxpose.xlu1.b32.end [2/2] (short) (narrow) %v17_v3, 88  ;;  %v120_v12 = vunpack.c.0.s8 %v119_v10 }
   0x7   :  { %2482 = vmatpush3.bf16.msk.msra.mxu0 %vm2481_vm2, %v2480_v7  ;;  %2484 = vmatpush3.bf16.msk.msra.mxu1 %vm2481_vm2, %v2480_v7 }
   0x8   :  { %v2547_v14 = vsub.s32 %v120_v12, %v122_v13 }
  0x82   :  { %v47_v15 = vpop.trf.xlu0  ;;  %v79_v16 = vpop.trf.xlu1 }
  0x83   :  { %v117_v17 = vcombine.high %v47_v15, %v47_v15  ;;  %v124_v18 = vrot.slane %v47_v15, %v2547_v14  ;;  %v294_v19 = vcombine.high %v79_v16, %v79_v16  ;;  %v2573_v1 = vrot.slane %v79_v16, %v2547_v14 }
  0x85   :  { %v131_v20 = vrot.slane %v117_v17, %v2547_v14  ;;  %v132_v21 = vcombine.high %v124_v18, %v124_v18  ;;  %v2552_v22 = vrot.slane %v294_v19, %v2547_v14 }
  0x86   :  { %v48_v23 = vpop.trf.xlu0  ;;  %v80_v24 = vpop.trf.xlu1 }
  0x87   :  { %v133_v25 = vcombine.high %v131_v20, %v131_v20  ;;  %v659_v26 = vcombine.low %v124_v18, %v132_v21  ;;  %v134_v27 = vcombine.high %v48_v23, %v48_v23  ;;  %v141_v28 = vrot.slane %v48_v23, %v2547_v14 }
  0x88   :  { %v310_v29 = vcombine.high %v2552_v22, %v2552_v22  ;;  %v311_v30 = vcombine.high %v80_v24, %v80_v24  ;;  %v318_v31 = vrot.slane %v80_v24, %v2547_v14 }
  0x89   :  { %v660_v32 = vcombine.low %v131_v20, %v133_v25  ;;  %v148_v33 = vrot.slane %v134_v27, %v2547_v14  ;;  %v149_v34 = vcombine.high %v141_v28, %v141_v28  ;;  %v667_v44 = vrot.slane %v659_v26, %v2547_v14 }
  0x8a   :  { %v325_v35 = vrot.slane %v311_v30, %v2547_v14  ;;  %v326_v36 = vcombine.high %v318_v31, %v318_v31  ;;  %v846_v37 = vcombine.low %v310_v29, %v318_v31  ;;  %v49_v38 = vpop.trf.xlu0  ;;  %v81_v39 = vpop.trf.xlu1 }
  0x8b   :  { %v674_v40 = vrot.slane %v660_v32, %v2547_v14  ;;  %v150_v41 = vcombine.high %v148_v33, %v148_v33  ;;  %v151_v42 = vcombine.high %v49_v38, %v49_v38  ;;  %v158_v43 = vrot.slane %v49_v38, %v2547_v14 }
  0x8c   :  { %v847_v45 = vcombine.low %v326_v36, %v325_v35  ;;  %v327_v46 = vcombine.high %v325_v35, %v325_v35  ;;  %v676_v47 = vcombine.low %v141_v28, %v149_v34  ;;  %v328_v50 = vcombine.high %v81_v39, %v81_v39 }
  0x8d   :  { %v165_v48 = vrot.slane %v151_v42, %v2547_v14  ;;  %v166_v49 = vcombine.high %v158_v43, %v158_v43  ;;  %v677_v51 = vcombine.low %v148_v33, %v150_v41  ;;  %v854_v52 = vrot.slane %v846_v37, %v2547_v14 }
  0x8e   :  { %v335_v53 = vrot.slane %v81_v39, %v2547_v14  ;;  %v50_v54 = vpop.trf.xlu0  ;;  %v82_v55 = vpop.trf.xlu1  ;;  %v675_v56 = vcombine.low %v667_v44, %v674_v40  ;;  %v861_v57 = vrot.slane %v847_v45, %v2547_v14  ;;  %v342_v60 = vrot.slane %v328_v50, %v2547_v14 }
  0x8f   :  { %v167_v58 = vcombine.high %v165_v48, %v165_v48  ;;  %v2567_v59 = vcombine.low %v158_v43, %v166_v49  ;;  %v168_v63 = vcombine.high %v50_v54, %v50_v54  ;;  %v175_v0 = vrot.slane %v50_v54, %v2547_v14 }
  0x90   :  { %v343_v61 = vcombine.high %v335_v53, %v335_v53  ;;  %v863_v62 = vcombine.low %v327_v46, %v335_v53  ;;  %2417 = vmatmul.mubr.msk.f32.vlgmr.msra.gmra.mrb[0].mxu0 %vm1376_vm4, %v675_v56  ;;  %v684_v2 = vrot.slane %v676_v47, %v2547_v14  ;;  %v344_v3 = vcombine.high %v342_v60, %v342_v60 }
  0x91   :  { %v345_v4 = vcombine.high %v82_v55, %v82_v55  ;;  %2419 = vmatprep.mubr.msk.f32.mxu0 %vm2502_vm3, %v2503_v8  ;;  %v691_v5 = vrot.slane %v677_v51, %v2547_v14  ;;  %v694_v6 = vcombine.low %v165_v48, %v167_v58  ;;  %v182_v9 = vrot.slane %v168_v63, %v2547_v14 }
  0x92   :  { %v864_v7 = vcombine.low %v343_v61, %v342_v60  ;;  %v51_v10 = vpop.trf.xlu0  ;;  %v83_v11 = vpop.trf.xlu1  ;;  %v701_v12 = vrot.slane %v2567_v59, %v2547_v14  ;;  %v352_v13 = vrot.slane %v82_v55, %v2547_v14  ;;  %v862_v16 = vcombine.low %v854_v52, %v861_v57 }
  0x93   :  { %v359_v15 = vrot.slane %v345_v4, %v2547_v14  ;;  %v871_v17 = vrot.slane %v863_v62, %v2547_v14  ;;  %v183_v18 = vcombine.high %v175_v0, %v175_v0  ;;  %v184_v19 = vcombine.high %v182_v9, %v182_v9 }
  0x94   :  { %v185_v20 = vcombine.high %v51_v10, %v51_v10  ;;  %v360_v21 = vcombine.high %v352_v13, %v352_v13  ;;  %v880_v23 = vcombine.low %v344_v3, %v352_v13  ;;  %2450 = vmatmul.mubr.msk.f32.vlgmr.msra.gmra.mrb[0].mxu1 %vm1376_vm4, %v862_v16  ;;  %v192_v24 = vrot.slane %v51_v10, %v2547_v14 }
  0x95   :  { %v361_v25 = vcombine.high %v359_v15, %v359_v15  ;;  %v878_v26 = vrot.slane %v864_v7, %v2547_v14  ;;  %v2588_v27 = vcombine.low %v182_v9, %v184_v19  ;;  %v362_v29 = vcombine.high %v83_v11, %v83_v11  ;;  %2452 = vmatprep.mubr.msk.f32.mxu1 %vm2502_vm3, %v2503_v8 }
  0x96   :  { %v199_v28 = vrot.slane %v185_v20, %v2547_v14  ;;  %v52_v30 = vpop.trf.xlu0  ;;  %v84_v31 = vpop.trf.xlu1  ;;  %v708_v32 = vrot.slane %v694_v6, %v2547_v14  ;;  %v881_v33 = vcombine.low %v360_v21, %v359_v15  ;;  %v200_v34 = vcombine.high %v192_v24, %v192_v24 }
  0x97   :  { %v369_v35 = vrot.slane %v83_v11, %v2547_v14  ;;  %v710_v36 = vcombine.low %v175_v0, %v183_v18  ;;  %v376_v38 = vrot.slane %v362_v29, %v2547_v14  ;;  %v692_v39 = vcombine.low %v684_v2, %v691_v5 }
  0x98   :  { %v201_v37 = vcombine.high %v199_v28, %v199_v28  ;;  %v888_v40 = vrot.slane %v880_v23, %v2547_v14  ;;  %v895_v41 = vrot.slane %v881_v33, %v2547_v14  ;;  %v725_v44 = vrot.slane %v2588_v27, %v2547_v14 }
  0x99   :  { %v377_v42 = vcombine.high %v369_v35, %v369_v35  ;;  %v897_v43 = vcombine.low %v361_v25, %v369_v35  ;;  %2420 = vmatmul.mubr.msk.f32.gmra.mrb[2].mxu0 %vm1376_vm4, %v692_v39  ;;  %v879_v45 = vcombine.low %v871_v17, %v878_v26  ;;  %v202_v46 = vcombine.high %v52_v30, %v52_v30 }
  0x9a   :  { %v209_v47 = vrot.slane %v52_v30, %v2547_v14  ;;  %v53_v48 = vpop.trf.xlu0  ;;  %v2602_v49 = vcombine.low %v192_v24, %v200_v34  ;;  %v2604_v50 = vcombine.low %v199_v28, %v201_v37  ;;  %2422 = vmatprep.mubr.msk.f32.mxu0 %vm2502_vm3, %v2503_v8  ;;  %v378_v52 = vcombine.high %v376_v38, %v376_v38  ;;  %v85_v57 = vpop.trf.xlu1 }
  0x9b   :  { %v898_v51 = vcombine.low %v377_v42, %v376_v38  ;;  %v905_v53 = vrot.slane %v897_v43, %v2547_v14  ;;  %2453 = vmatmul.mubr.msk.f32.gmra.mrb[2].mxu1 %vm1376_vm4, %v879_v45  ;;  %v216_v54 = vrot.slane %v202_v46, %v2547_v14  ;;  %v379_v56 = vcombine.high %v84_v31, %v84_v31 }
  0x9c   :  { %v217_v55 = vcombine.high %v209_v47, %v209_v47  ;;  %v386_v59 = vrot.slane %v84_v31, %v2547_v14  ;;  %v709_v60 = vcombine.low %v701_v12, %v708_v32  ;;  %2455 = vmatprep.mubr.msk.f32.mxu1 %vm2502_vm3, %v2503_v8  ;;  %v896_v61 = vcombine.low %v888_v40, %v895_v41 }
  0x9d   :  { %v912_v58 = vrot.slane %v898_v51, %v2547_v14  ;;  %v218_v62 = vcombine.high %v216_v54, %v216_v54  ;;  %v393_v0 = vrot.slane %v379_v56, %v2547_v14  ;;  %v219_v2 = vcombine.high %v53_v48, %v53_v48 }
  0x9e   :  { %v2615_v63 = vcombine.low %v209_v47, %v217_v55  ;;  %v394_v3 = vcombine.high %v386_v59, %v386_v59  ;;  %v914_v4 = vcombine.low %v378_v52, %v386_v59  ;;  %2423 = vmatmul.mubr.msk.f32.gmra.mrb[4].mxu0 %vm1376_vm4, %v709_v60  ;;  %v226_v5 = vrot.slane %v53_v48, %v2547_v14  ;;  %v54_v7 = vpop.trf.xlu0  ;;  %v86_v21 = vpop.trf.xlu1 }
  0x9f   :  { %v396_v6 = vcombine.high %v85_v57, %v85_v57  ;;  %v718_v9 = vrot.slane %v710_v36, %v2547_v14  ;;  %v735_v10 = vrot.slane %v2602_v49, %v2547_v14  ;;  %2425 = vmatprep.mubr.msk.f32.mxu0 %vm2502_vm3, %v2503_v8  ;;  %2456 = vmatmul.mubr.msk.f32.gmra.mrb[4].mxu1 %vm1376_vm4, %v896_v61 }
  0xa0   :  { %v233_v11 = vrot.slane %v219_v2, %v2547_v14  ;;  %v742_v12 = vrot.slane %v2604_v50, %v2547_v14  ;;  %v745_v13 = vcombine.low %v216_v54, %v218_v62  ;;  %v915_v15 = vcombine.low %v394_v3, %v393_v0  ;;  %2458 = vmatprep.mubr.msk.f32.mxu1 %vm2502_vm3, %v2503_v8 }
  0xa1   :  { %v395_v16 = vcombine.high %v393_v0, %v393_v0  ;;  %v234_v17 = vcombine.high %v226_v5, %v226_v5  ;;  %v403_v19 = vrot.slane %v85_v57, %v2547_v14  ;;  %v410_v20 = vrot.slane %v396_v6, %v2547_v14 }
  0xa2   :  { %v235_v18 = vcombine.high %v233_v11, %v233_v11  ;;  %v752_v23 = vrot.slane %v2615_v63, %v2547_v14  ;;  %v922_v24 = vrot.slane %v914_v4, %v2547_v14  ;;  %v726_v25 = vcombine.low %v718_v9, %v725_v44  ;;  %v55_v34 = vpop.trf.xlu0  ;;  %v87_v47 = vpop.trf.xlu1 }
  0xa3   :  { %v913_v26 = vcombine.low %v905_v53, %v912_v58  ;;  %v929_v27 = vrot.slane %v915_v15, %v2547_v14  ;;  %v411_v28 = vcombine.high %v403_v19, %v403_v19  ;;  %v931_v29 = vcombine.low %v395_v16, %v403_v19 }
  0xa4   :  { %v236_v30 = vcombine.high %v54_v7, %v54_v7  ;;  %v759_v31 = vrot.slane %v745_v13, %v2547_v14  ;;  %2426 = vmatmul.mubr.msk.f32.gmra.mrb[6].mxu0 %vm1376_vm4, %v726_v25  ;;  %v243_v32 = vrot.slane %v54_v7, %v2547_v14  ;;  %v412_v33 = vcombine.high %v410_v20, %v410_v20 }
  0xa5   :  { %2459 = vmatmul.mubr.msk.f32.gmra.mrb[6].mxu1 %vm1376_vm4, %v913_v26  ;;  %v761_v35 = vcombine.low %v226_v5, %v234_v17  ;;  %v762_v36 = vcombine.low %v233_v11, %v235_v18  ;;  %v932_v37 = vcombine.low %v411_v28, %v410_v20  ;;  %2428 = vmatprep.mubr.msk.f32.mxu0 %vm2502_vm3, %v2503_v8 }
  0xa6   :  { %v250_v38 = vrot.slane %v236_v30, %v2547_v14  ;;  %v251_v39 = vcombine.high %v243_v32, %v243_v32  ;;  %v413_v40 = vcombine.high %v86_v21, %v86_v21  ;;  %v420_v41 = vrot.slane %v86_v21, %v2547_v14  ;;  %2461 = vmatprep.mubr.msk.f32.mxu1 %vm2502_vm3, %v2503_v8  ;;  %v56_v59 = vpop.trf.xlu0 }
  0xa7   :  { %v743_v42 = vcombine.low %v735_v10, %v742_v12  ;;  %v939_v43 = vrot.slane %v931_v29, %v2547_v14  ;;  %v930_v45 = vcombine.low %v922_v24, %v929_v27  ;;  %v253_v46 = vcombine.high %v55_v34, %v55_v34  ;;  %v88_v10 = vpop.trf.xlu1 }
  0xa8   :  { %v252_v44 = vcombine.high %v250_v38, %v250_v38  ;;  %v946_v48 = vrot.slane %v932_v37, %v2547_v14  ;;  %v427_v49 = vrot.slane %v413_v40, %v2547_v14  ;;  %v428_v50 = vcombine.high %v420_v41, %v420_v41 }
  0xa9   :  { %v948_v51 = vcombine.low %v412_v33, %v420_v41  ;;  %2429 = vmatmul.mubr.msk.f32.gmra.mrb[8].mxu0 %vm1376_vm4, %v743_v42  ;;  %v769_v52 = vrot.slane %v761_v35, %v2547_v14  ;;  %2462 = vmatmul.mubr.msk.f32.gmra.mrb[8].mxu1 %vm1376_vm4, %v930_v45  ;;  %v260_v53 = vrot.slane %v55_v34, %v2547_v14 }
  0xaa   :  { %2431 = vmatprep.mubr.msk.f32.mxu0 %vm2502_vm3, %v2503_v8  ;;  %v267_v54 = vrot.slane %v253_v46, %v2547_v14  ;;  %v776_v55 = vrot.slane %v762_v36, %v2547_v14  ;;  %v778_v56 = vcombine.low %v243_v32, %v251_v39  ;;  %v949_v57 = vcombine.low %v428_v50, %v427_v49  ;;  %v57_v32 = vpop.trf.xlu0 }
  0xab   :  { %v429_v58 = vcombine.high %v427_v49, %v427_v49  ;;  %2464 = vmatprep.mubr.msk.f32.mxu1 %vm2502_vm3, %v2503_v8  ;;  %v779_v60 = vcombine.low %v250_v38, %v252_v44  ;;  %v268_v61 = vcombine.high %v260_v53, %v260_v53  ;;  %v430_v63 = vcombine.high %v87_v47, %v87_v47  ;;  %v89_v36 = vpop.trf.xlu1 }
  0xac   :  { %v269_v62 = vcombine.high %v267_v54, %v267_v54  ;;  %v956_v0 = vrot.slane %v948_v51, %v2547_v14  ;;  %v437_v2 = vrot.slane %v87_v47, %v2547_v14  ;;  %v760_v3 = vcombine.low %v752_v23, %v759_v31 }
  0xad   :  { %v947_v4 = vcombine.low %v939_v43, %v946_v48  ;;  %v963_v5 = vrot.slane %v949_v57, %v2547_v14  ;;  %v444_v7 = vrot.slane %v430_v63, %v2547_v14  ;;  %v270_v9 = vcombine.high %v56_v59, %v56_v59 }
  0xae   :  { %v796_v6 = vcombine.low %v267_v54, %v269_v62  ;;  %v445_v11 = vcombine.high %v437_v2, %v437_v2  ;;  %v965_v12 = vcombine.low %v429_v58, %v437_v2  ;;  %2432 = vmatmul.mubr.msk.f32.gmra.mrb[10].mxu0 %vm1376_vm4, %v760_v3  ;;  %v277_v13 = vrot.slane %v56_v59, %v2547_v14  ;;  %v20_v58 = vld [vmem:[%s3209_s2] sm:$0xff]  ;;  %v21_v59 = vld [vmem:[%s3209_s2 + $0x8] sm:$0xff]  ;;  %v22_v62 = vld [vmem:[%s3209_s2 + $0x10] sm:$0xff] }
  0xaf   :  { %2465 = vmatmul.mubr.msk.f32.gmra.mrb[10].mxu1 %vm1376_vm4, %v947_v4  ;;  %v793_v15 = vrot.slane %v779_v60, %v2547_v14  ;;  %v795_v16 = vcombine.low %v260_v53, %v268_v61  ;;  %2434 = vmatprep.mubr.msk.f32.mxu0 %vm2502_vm3, %v2503_v8  ;;  %v284_v17 = vrot.slane %v270_v9, %v2547_v14  ;;  %v23_v4 = vld [vmem:[%s3209_s2 + $0x18] sm:$0xff]  ;;  %v24_v9 = vld [vmem:[%s3209_s2 + $0x20] sm:$0xff] }
  0xb0   :  { %v446_v18 = vcombine.high %v444_v7, %v444_v7  ;;  %v966_v19 = vcombine.low %v445_v11, %v444_v7  ;;  %v973_v20 = vrot.slane %v965_v12, %v2547_v14  ;;  %v285_v21 = vcombine.high %v277_v13, %v277_v13  ;;  %2467 = vmatprep.mubr.msk.f32.mxu1 %vm2502_vm3, %v2503_v8 }
  0xb1   :  { %v447_v23 = vcombine.high %v88_v10, %v88_v10  ;;  %v286_v24 = vcombine.high %v284_v17, %v284_v17  ;;  %v454_v25 = vrot.slane %v88_v10, %v2547_v14  ;;  %v777_v26 = vcombine.low %v769_v52, %v776_v55 }
  0xb2   :  { %v964_v27 = vcombine.low %v956_v0, %v963_v5  ;;  %v786_v28 = vrot.slane %v778_v56, %v2547_v14  ;;  %v810_v29 = vrot.slane %v796_v6, %v2547_v14  ;;  %v980_v30 = vrot.slane %v966_v19, %v2547_v14 }
  0xb3   :  { %v461_v31 = vrot.slane %v447_v23, %v2547_v14  ;;  %v813_v33 = vcombine.low %v284_v17, %v286_v24  ;;  %v462_v34 = vcombine.high %v454_v25, %v454_v25  ;;  %v982_v35 = vcombine.low %v446_v18, %v454_v25  ;;  %2435 = vmatmul.mubr.msk.f32.gmra.mrb[12].mxu0 %vm1376_vm4, %v777_v26 }
  0xb4   :  { %2468 = vmatmul.mubr.msk.f32.gmra.mrb[12].mxu1 %vm1376_vm4, %v964_v27  ;;  %v803_v37 = vrot.slane %v795_v16, %v2547_v14  ;;  %v812_v38 = vcombine.low %v277_v13, %v285_v21  ;;  %2437 = vmatprep.mubr.msk.f32.mxu0 %vm2502_vm3, %v2503_v8  ;;  %v794_v39 = vcombine.low %v786_v28, %v793_v15 }
  0xb5   :  { %2470 = vmatprep.mubr.msk.f32.mxu1 %vm2502_vm3, %v2503_v8  ;;  %v983_v40 = vcombine.low %v462_v34, %v461_v31  ;;  %v990_v41 = vrot.slane %v982_v35, %v2547_v14  ;;  %v293_v42 = vrot.slane %v57_v32, %v2547_v14  ;;  %v981_v43 = vcombine.low %v973_v20, %v980_v30  ;;  %v25_v34 = vld [vmem:[%s3209_s2 + $0x28] sm:$0xff] }
  0xb6   :  { %v309_v44 = vcombine.high %v2573_v1, %v2573_v1  ;;  %v463_v45 = vcombine.high %v461_v31, %v461_v31  ;;  %v470_v46 = vrot.slane %v89_v36, %v2547_v14  ;;  %v827_v47 = vrot.slane %v813_v33, %v2547_v14 }
  0xb7   :  { %v997_v48 = vrot.slane %v983_v40, %v2547_v14  ;;  %2438 = vmatmul.mubr.msk.f32.gmra.mrb[14].mxu0 %vm1376_vm4, %v794_v39  ;;  %v811_v49 = vcombine.low %v803_v37, %v810_v29  ;;  %v820_v51 = vrot.slane %v812_v38, %v2547_v14  ;;  %v829_v52 = vcombine.low %v293_v42, %v2573_v1 }
  0xb8   :  { %2471 = vmatmul.mubr.msk.f32.gmra.mrb[14].mxu1 %vm1376_vm4, %v981_v43  ;;  %2440 = vmatprep.mubr.msk.f32.mxu0 %vm2502_vm3, %v2503_v8  ;;  %v999_v50 = vcombine.low %v463_v45, %v470_v46  ;;  %v830_v54 = vcombine.low %v309_v44, %v2552_v22  ;;  %v482_v60 = vcombine.high %v20_v58, %v20_v58  ;;  %v26_v46 = vld [vmem:[%s3209_s2 + $0x30] sm:$0xff] }
  0xb9   :  { %2473 = vmatprep.mubr.msk.f32.mxu1 %vm2502_vm3, %v2503_v8  ;;  %v998_v53 = vcombine.low %v990_v41, %v997_v48  ;;  %v828_v56 = vcombine.low %v820_v51, %v827_v47  ;;  %v837_v57 = vrot.slane %v829_v52, %v2547_v14  ;;  %v499_v61 = vcombine.high %v21_v59, %v21_v59  ;;  %v27_v51 = vld [vmem:[%s3209_s2 + $0x38] sm:$0xff] }
  0xba   :  { %v1006_v55 = vrot.slane %v999_v50, %v2547_v14  ;;  %v844_v1 = vrot.slane %v830_v54, %v2547_v14  ;;  %v2726_v63 = vrot.slane %v20_v58, %v2547_v14  ;;  %v2729_v0 = vrot.slane %v482_v60, %v2547_v14 }
  0xbb   :  { %2441 = vmatmul.mubr.msk.f32.gmra.mrb[16].mxu0 %vm1376_vm4, %v811_v49  ;;  %v506_v2 = vrot.slane %v21_v59, %v2547_v14  ;;  %v513_v3 = vrot.slane %v499_v61, %v2547_v14  ;;  %v523_v6 = vrot.slane %v22_v62, %v2547_v14  ;;  %v533_v13 = vcombine.high %v23_v4, %v23_v4 }
  0xbc   :  { %2474 = vmatmul.mubr.msk.f32.gmra.mrb[16].mxu1 %vm1376_vm4, %v998_v53  ;;  %2443 = vmatprep.mubr.msk.f32.mxu0 %vm2502_vm3, %v2503_v8  ;;  %v845_v22 = vcombine.low %v837_v57, %v844_v1  ;;  %v2738_v5 = vcombine.high %v2726_v63, %v2726_v63  ;;  %v498_v10 = vcombine.high %v2729_v0, %v2729_v0 }
  0xbd   :  { %2476 = vmatprep.mubr.msk.f32.mxu1 %vm2502_vm3, %v2503_v8  ;;  %v514_v11 = vcombine.high %v506_v2, %v506_v2  ;;  %v515_v12 = vcombine.high %v513_v3, %v513_v3  ;;  %v550_v15 = vcombine.high %v24_v9, %v24_v9  ;;  %v531_v17 = vcombine.high %v523_v6, %v523_v6 }
  0xbe   :  { %v1007_v16 = vcombine.low %v2726_v63, %v2738_v5  ;;  %v1008_v19 = vcombine.low %v2729_v0, %v498_v10  ;;  %v540_v23 = vrot.slane %v23_v4, %v2547_v14  ;;  %v1194_v24 = vcombine.low %v498_v10, %v506_v2  ;;  %v28_v10 = vld [vmem:[%s3209_s2 + $0x40] sm:$0xff] }
  0xbf   :  { %2444 = vmatmul.mubr.msk.f32.gmra.mrb[18].mxu0 %vm1376_vm4, %v828_v56  ;;  %v1024_v20 = vcombine.low %v506_v2, %v514_v11  ;;  %v1025_v21 = vcombine.low %v513_v3, %v515_v12  ;;  %v547_v25 = vrot.slane %v533_v13, %v2547_v14  ;;  %v557_v26 = vrot.slane %v24_v9, %v2547_v14 }
  0xc0   :  { %2477 = vmatmul.mubr.msk.f32.gmra.mrb[18].mxu1 %vm1376_vm4, %v1006_v55  ;;  %2446 = vmatprep.mubr.msk.f32.mxu0 %vm2502_vm3, %v2503_v8  ;;  %v516_v8 = vcombine.high %v22_v62, %v22_v62  ;;  %v1195_v27 = vcombine.low %v514_v11, %v513_v3  ;;  %v1211_v28 = vcombine.low %v515_v12, %v523_v6 }
  0xc1   :  { %v564_v29 = vrot.slane %v550_v15, %v2547_v14  ;;  %v2755_v30 = vrot.slane %v1007_v16, %v2547_v14  ;;  %v1041_v31 = vcombine.low %v523_v6, %v531_v17  ;;  %v2761_v35 = vrot.slane %v1008_v19, %v2547_v14 }
  0xc2   :  { %v530_v7 = vrot.slane %v516_v8, %v2547_v14  ;;  %v2764_v36 = vrot.slane %v1024_v20, %v2547_v14  ;;  %v2767_v37 = vrot.slane %v1025_v21, %v2547_v14  ;;  %v548_v38 = vcombine.high %v540_v23, %v540_v23  ;;  %v29_v20 = vld [vmem:[%s3209_s2 + $0x48] sm:$0xff] }
  0xc3   :  { %2447 = vmatmul.mubr.msk.f32.gmra.mrb[20].mxu0 %vm1376_vm4, %v845_v22  ;;  %v2770_v39 = vrot.slane %v1194_v24, %v2547_v14  ;;  %v549_v40 = vcombine.high %v547_v25, %v547_v25  ;;  %v565_v41 = vcombine.high %v557_v26, %v557_v26  ;;  %v2773_v42 = vrot.slane %v1195_v27, %v2547_v14 }
  0xc4   :  { %v532_v18 = vcombine.high %v530_v7, %v530_v7  ;;  %v1212_v33 = vcombine.low %v531_v17, %v530_v7  ;;  %v2776_v43 = vrot.slane %v1211_v28, %v2547_v14  ;;  %v566_v44 = vcombine.high %v564_v29, %v564_v29 }
  0xc5   :  { %v567_v45 = vcombine.high %v25_v34, %v25_v34  ;;  %v2782_v47 = vrot.slane %v1041_v31, %v2547_v14  ;;  %v574_v50 = vrot.slane %v25_v34, %v2547_v14  ;;  %v1023_v52 = vcombine.low %v2755_v30, %v2761_v35 }
  0xc6   :  { %v1042_v32 = vcombine.low %v530_v7, %v532_v18  ;;  %v2788_v49 = vrot.slane %v1212_v33, %v2547_v14  ;;  %v1040_v53 = vcombine.low %v2764_v36, %v2767_v37  ;;  %v1228_v54 = vcombine.low %v532_v18, %v540_v23 }
  0xc7   :  { %v1229_v55 = vcombine.low %v548_v38, %v547_v25  ;;  %v1058_v56 = vcombine.low %v540_v23, %v548_v38  ;;  %v1059_v57 = vcombine.low %v547_v25, %v549_v40  ;;  %v1075_v1 = vcombine.low %v557_v26, %v565_v41 }
  0xc8   :  { %v2785_v48 = vrot.slane %v1042_v32, %v2547_v14  ;;  %v584_v22 = vcombine.high %v26_v46, %v26_v46  ;;  %v1210_v58 = vcombine.low %v2770_v39, %v2773_v42  ;;  %v1076_v59 = vcombine.low %v564_v29, %v566_v44  ;;  %v2366_v39 = vld.sshfl [vmem:[%s3209_s2 + $0x50] sm:$0x3 pattern:$0x76325410] }
  0xc9   :  { %v581_v60 = vrot.slane %v567_v45, %v2547_v14  ;;  %v601_v61 = vcombine.high %v27_v51, %v27_v51  ;;  %v1227_v8 = vcombine.low %v2776_v43, %v2788_v49  ;;  %v582_v2 = vcombine.high %v574_v50, %v574_v50 }
  0xca   :  { %v1057_v62 = vcombine.low %v2782_v47, %v2785_v48  ;;  %v591_v3 = vrot.slane %v26_v46, %v2547_v14  ;;  %v2807_v4 = vrot.slane %v1228_v54, %v2547_v14  ;;  %v2810_v6 = vrot.slane %v1229_v55, %v2547_v14 }
  0xcb   :  { %v1245_v7 = vcombine.low %v549_v40, %v557_v26  ;;  %v1246_v9 = vcombine.low %v565_v41, %v564_v29  ;;  %v2816_v11 = vrot.slane %v1058_v56, %v2547_v14  ;;  %v2819_v12 = vrot.slane %v1059_v57, %v2547_v14 }
  0xcc   :  { %v2822_v13 = vrot.slane %v1075_v1, %v2547_v14  ;;  %v598_v15 = vrot.slane %v584_v22, %v2547_v14  ;;  %v2826_v16 = vrot.slane %v1076_v59, %v2547_v14  ;;  %v583_v17 = vcombine.high %v581_v60, %v581_v60 }
  0xcd   :  { %v608_v18 = vrot.slane %v27_v51, %v2547_v14  ;;  %v615_v19 = vrot.slane %v601_v61, %v2547_v14  ;;  %v1262_v21 = vcombine.low %v566_v44, %v574_v50  ;;  %v1263_v23 = vcombine.low %v582_v2, %v581_v60 }
  0xce   :  { %v599_v24 = vcombine.high %v591_v3, %v591_v3  ;;  %v618_v25 = vcombine.high %v28_v10, %v28_v10  ;;  %v1244_v26 = vcombine.low %v2807_v4, %v2810_v6  ;;  %v2836_v27 = vrot.slane %v1245_v7, %v2547_v14 }
  0xcf   :  { %v2839_v28 = vrot.slane %v1246_v9, %v2547_v14  ;;  %v2842_v29 = vrot.slane %v28_v10, %v2547_v14  ;;  %v1074_v31 = vcombine.low %v2816_v11, %v2819_v12  ;;  %v1092_v32 = vcombine.low %v574_v50, %v582_v2 }
  0xd0   :  { %v600_v33 = vcombine.high %v598_v15, %v598_v15  ;;  %v635_v34 = vcombine.high %v29_v20, %v29_v20  ;;  %v1091_v38 = vcombine.low %v2822_v13, %v2826_v16  ;;  %v1093_v40 = vcombine.low %v581_v60, %v583_v17 }
  0xd1   :  { %v616_v41 = vcombine.high %v608_v18, %v608_v18  ;;  %v617_v44 = vcombine.high %v615_v19, %v615_v19  ;;  %v2849_v45 = vrot.slane %v1262_v21, %v2547_v14  ;;  %v2852_v46 = vrot.slane %v1263_v23, %v2547_v14 }
  0xd2   :  { %v1109_v51 = vcombine.low %v591_v3, %v599_v24  ;;  %v632_v54 = vrot.slane %v618_v25, %v2547_v14  ;;  %v1261_v50 = vcombine.low %v2836_v27, %v2839_v28  ;;  %v1279_v55 = vcombine.low %v583_v17, %v591_v3 }
  0xd3   :  { %v1280_v56 = vcombine.low %v599_v24, %v598_v15  ;;  %v633_v57 = vcombine.high %v2842_v29, %v2842_v29  ;;  %v2860_v1 = vrot.slane %v1092_v32, %v2547_v14  ;;  %v1110_v22 = vcombine.low %v598_v15, %v600_v33 }
  0xd4   :  { %v2863_v59 = vrot.slane %v29_v20, %v2547_v14  ;;  %v2866_v60 = vrot.slane %v635_v34, %v2547_v14  ;;  %v1126_v61 = vcombine.low %v608_v18, %v616_v41  ;;  %v1127_v2 = vcombine.low %v615_v19, %v617_v44 }
  0xd5   :  { %v1296_v7 = vcombine.low %v600_v33, %v608_v18  ;;  %v1297_v9 = vcombine.low %v616_v41, %v615_v19  ;;  %v2869_v3 = vrot.slane %v1093_v40, %v2547_v14  ;;  %v2874_v17 = vrot.slane %v1109_v51, %v2547_v14 }
  0xd6   :  { %v634_v15 = vcombine.high %v632_v54, %v632_v54  ;;  %v2877_v20 = vrot.slane %v1279_v55, %v2547_v14  ;;  %v2880_v23 = vrot.slane %v1280_v56, %v2547_v14  ;;  %v1313_v18 = vcombine.low %v617_v44, %v2842_v29 }
  0xd7   :  { %v1314_v19 = vcombine.low %v633_v57, %v632_v54  ;;  %v2887_v32 = vrot.slane %v1110_v22, %v2547_v14  ;;  %v650_v33 = vcombine.high %v2863_v59, %v2863_v59  ;;  %v2893_v34 = vcombine.high %v2866_v60, %v2866_v60 }
  0xd8   :  { %v2896_v40 = vrot.slane %v1126_v61, %v2547_v14  ;;  %v2899_v41 = vrot.slane %v1127_v2, %v2547_v14  ;;  %v2902_v30 = vrot.slane %v1296_v7, %v2547_v14  ;;  %v2905_v35 = vrot.slane %v1297_v9, %v2547_v14 }
  0xd9   :  { %v1143_v51 = vcombine.low %v2842_v29, %v633_v57  ;;  %v1144_v55 = vcombine.low %v632_v54, %v634_v15  ;;  %v2914_v61 = vrot.slane %v1313_v18, %v2547_v14  ;;  %v2917_v2 = vrot.slane %v1314_v19, %v2547_v14 }
  0xda   :  { %v1160_v29 = vcombine.low %v2863_v59, %v650_v33  ;;  %v1161_v54 = vcombine.low %v2866_v60, %v2893_v34  ;;  %v1125_v18 = vcombine.low %v2874_v17, %v2887_v32 }
  0xdb   :  { %v2933_v56 = vrot.slane %v1143_v51, %v2547_v14  ;;  %v2936_v10 = vrot.slane %v1144_v55, %v2547_v14 }
  0xdc   :  { %v2949_v51 = vrot.slane %v1160_v29, %v2547_v14  ;;  %v2952_v55 = vrot.slane %v1161_v54, %v2547_v14 }
  0xdd   :  { %v1159_v54 = vcombine.low %v2933_v56, %v2936_v10 }
 0x163   :  { %v1489_v21 = vpop.f32.mrb[0].mxu0 }
 0x164   :  { %v1490_v24 = vadd.f32 %v1489_v21, %v1023_v52  ;;  %v2418_v25 = vpop.f32.mrb[1].mxu0 }
 0x166   :  { %v1614_v52 = vcombine.high %v1490_v24, %v1490_v24  ;;  %v1621_v44 = vrot.slane %v1490_v24, %v2547_v14 }
 0x167   :  { %v1544_v21 = vpop.f32.mrb[0].mxu1 }
 0x168   :  { %v1628_v7 = vrot.slane %v1614_v52, %v2547_v14  ;;  %v1629_v9 = vcombine.high %v1621_v44, %v1621_v44  ;;  %v1545_v57 = vadd.f32 %v1544_v21, %v1210_v58  ;;  %v2451_v24 = vpop.f32.mrb[1].mxu1  ;;  %v1330_v21 = vcombine.low %v634_v15, %v2863_v59 }
 0x169   :  { %v1331_v24 = vcombine.low %v650_v33, %v2866_v60  ;;  %v1177_v59 = vcombine.low %v2366_v39, %v2726_v63  ;;  %v1178_v60 = vcombine.low %v2738_v5, %v2729_v0  ;;  %v1347_v0 = vcombine.low %v2893_v34, %v2366_v39 }
 0x16a   :  { %v1630_v52 = vcombine.high %v1628_v7, %v1628_v7  ;;  %v1962_v22 = vcombine.low %v1621_v44, %v1629_v9  ;;  %v1801_v42 = vcombine.high %v1545_v57, %v1545_v57  ;;  %v2942_v58 = vrot.slane %v1545_v57, %v2547_v14 }
 0x16b   :  { %v2968_v44 = vrot.slane %v1330_v21, %v2547_v14  ;;  %v2971_v63 = vrot.slane %v1331_v24, %v2547_v14  ;;  %v2981_v21 = vrot.slane %v1177_v59, %v2547_v14  ;;  %v2984_v24 = vrot.slane %v1178_v60, %v2547_v14 }
 0x16c   :  { %v1963_v25 = vcombine.low %v1628_v7, %v1630_v52  ;;  %v1494_v9 = vpop.f32.mrb[2].mxu0  ;;  %v1815_v19 = vrot.slane %v1801_v42, %v2547_v14  ;;  %v1816_v57 = vcombine.high %v2942_v58, %v2942_v58  ;;  %v1970_v15 = vrot.slane %v1962_v22, %v2547_v14 }
 0x16d   :  { %v1495_v7 = vadd.f32 %v1494_v9, %v1040_v53  ;;  %v2421_v29 = vpop.f32.mrb[3].mxu0  ;;  %v1176_v9 = vcombine.low %v2949_v51, %v2952_v55 }
 0x16e   :  { %v1977_v33 = vrot.slane %v1963_v25, %v2547_v14  ;;  %v2156_v52 = vcombine.low %v1816_v57, %v1815_v19  ;;  %v1549_v42 = vpop.f32.mrb[2].mxu1  ;;  %v1817_v53 = vcombine.high %v1815_v19, %v1815_v19 }
 0x16f   :  { %v1631_v22 = vcombine.high %v1495_v7, %v1495_v7  ;;  %v1638_v25 = vrot.slane %v1495_v7, %v2547_v14  ;;  %v1550_v36 = vadd.f32 %v1549_v42, %v1227_v8  ;;  %v2454_v37 = vpop.f32.mrb[3].mxu1 }
 0x170   :  { %v1978_v5 = vcombine.low %v1970_v15, %v1977_v33  ;;  %v2164_v39 = vrot.slane %v2156_v52, %v2547_v14  ;;  %v1346_v15 = vcombine.low %v2968_v44, %v2971_v63  ;;  %v2999_v33 = vrot.slane %v1347_v0, %v2547_v14 }
 0x171   :  { %v1645_v34 = vrot.slane %v1631_v22, %v2547_v14  ;;  %v1646_v43 = vcombine.high %v1638_v25, %v1638_v25  ;;  %v1499_v49 = vpop.f32.mrb[4].mxu0  ;;  %v1818_v8 = vcombine.high %v1550_v36, %v1550_v36  ;;  %v1825_v19 = vrot.slane %v1550_v36, %v2547_v14 }
 0x172   :  { %2339 = vst.msk [vmem:[%s3210_s3] sm:$0xff] %vm2338_vm5, %v1978_v5  ;;  %v1500_v57 = vadd.f32 %v1499_v49, %v1057_v62  ;;  %v2424_v59 = vpop.f32.mrb[5].mxu0  ;;  %v1554_v60 = vpop.f32.mrb[4].mxu1 }
 0x173   :  { %v1647_v7 = vcombine.high %v1645_v34, %v1645_v34  ;;  %v1979_v29 = vcombine.low %v1638_v25, %v1646_v43  ;;  %v1832_v42 = vrot.slane %v1818_v8, %v2547_v14  ;;  %v1833_v5 = vcombine.high %v1825_v19, %v1825_v19  ;;  %v2457_v22 = vpop.f32.mrb[5].mxu1 }
 0x174   :  { %v1648_v36 = vcombine.high %v1500_v57, %v1500_v57  ;;  %v1655_v52 = vrot.slane %v1500_v57, %v2547_v14  ;;  %v2157_v37 = vcombine.low %v1817_v53, %v1825_v19  ;;  %v1555_v47 = vadd.f32 %v1554_v60, %v1244_v26 }
 0x175   :  { %v1980_v48 = vcombine.low %v1645_v34, %v1647_v7  ;;  %v2173_v62 = vcombine.low %v1833_v5, %v1832_v42  ;;  %v1834_v49 = vcombine.high %v1832_v42, %v1832_v42  ;;  %v1987_v22 = vrot.slane %v1979_v29, %v2547_v14 }
 0x176   :  { %v1662_v25 = vrot.slane %v1648_v36, %v2547_v14  ;;  %v1663_v43 = vcombine.high %v1655_v52, %v1655_v52  ;;  %v2171_v8 = vrot.slane %v2157_v37, %v2547_v14  ;;  %v1835_v59 = vcombine.high %v1555_v47, %v1555_v47 }
 0x177   :  { %v1994_v53 = vrot.slane %v1980_v48, %v2547_v14  ;;  %v2181_v19 = vrot.slane %v2173_v62, %v2547_v14  ;;  %v1504_v4 = vpop.f32.mrb[6].mxu0  ;;  %v1842_v6 = vrot.slane %v1555_v47, %v2547_v14 }
 0x178   :  { %v1559_v26 = vpop.f32.mrb[6].mxu1  ;;  %v1664_v34 = vcombine.high %v1662_v25, %v1662_v25  ;;  %v1996_v57 = vcombine.low %v1655_v52, %v1663_v43  ;;  %v2172_v60 = vcombine.low %v2164_v39, %v2171_v8  ;;  %v1505_v7 = vadd.f32 %v1504_v4, %v1074_v31  ;;  %v2427_v42 = vpop.f32.mrb[7].mxu0 }
 0x179   :  { %v2460_v5 = vpop.f32.mrb[7].mxu1  ;;  %v1995_v36 = vcombine.low %v1987_v22, %v1994_v53  ;;  %v1849_v29 = vrot.slane %v1835_v59, %v2547_v14  ;;  %v1850_v37 = vcombine.high %v1842_v6, %v1842_v6  ;;  %v2174_v48 = vcombine.low %v1834_v49, %v1842_v6 }
 0x17a   :  { %v1997_v0 = vcombine.low %v1662_v25, %v1664_v34  ;;  %v2004_v62 = vrot.slane %v1996_v57, %v2547_v14  ;;  %2352 = vst.msk [vmem:[%s3210_s3 + $0x60] sm:$0xff] %vm2338_vm5, %v2172_v60  ;;  %v1665_v39 = vcombine.high %v1505_v7, %v1505_v7  ;;  %v1672_v52 = vrot.slane %v1505_v7, %v2547_v14 }
 0x17b   :  { %2340 = vst.msk [vmem:[%s3210_s3 + $0x8] sm:$0xff] %vm2338_vm5, %v1995_v36  ;;  %v2188_v11 = vrot.slane %v2174_v48, %v2547_v14  ;;  %v2190_v12 = vcombine.low %v1850_v37, %v1849_v29  ;;  %v1560_v47 = vadd.f32 %v1559_v26, %v1261_v50  ;;  %v1851_v49 = vcombine.high %v1849_v29, %v1849_v29 }
 0x17c   :  { %v1509_v31 = vpop.f32.mrb[8].mxu0  ;;  %v2011_v25 = vrot.slane %v1997_v0, %v2547_v14  ;;  %v1679_v43 = vrot.slane %v1665_v39, %v2547_v14  ;;  %v1680_v8 = vcombine.high %v1672_v52, %v1672_v52  ;;  %v1564_v53 = vpop.f32.mrb[8].mxu1  ;;  %v3211_v5 = vcombine.low %v2849_v45, %v2852_v46 }
 0x17d   :  { %v1510_v59 = vadd.f32 %v1509_v31, %v1091_v38  ;;  %v2430_v22 = vpop.f32.mrb[9].mxu0  ;;  %v2189_v4 = vcombine.low %v2181_v19, %v2188_v11  ;;  %v2198_v6 = vrot.slane %v2190_v12, %v2547_v14  ;;  %v1852_v34 = vcombine.high %v1560_v47, %v1560_v47  ;;  %v2463_v27 = vpop.f32.mrb[9].mxu1 }
 0x17e   :  { %v1859_v57 = vrot.slane %v1560_v47, %v2547_v14  ;;  %v2012_v28 = vcombine.low %v2004_v62, %v2011_v25  ;;  %v1681_v50 = vcombine.high %v1679_v43, %v1679_v43  ;;  %v2013_v26 = vcombine.low %v1672_v52, %v1680_v8 }
 0x17f   :  { %v1682_v0 = vcombine.high %v1510_v59, %v1510_v59  ;;  %2353 = vst.msk [vmem:[%s3210_s3 + $0x68] sm:$0xff] %vm2338_vm5, %v2189_v4  ;;  %v1689_v13 = vrot.slane %v1510_v59, %v2547_v14  ;;  %v1866_v16 = vrot.slane %v1852_v34, %v2547_v14  ;;  %v1565_v36 = vadd.f32 %v1564_v53, %v3211_v5 }
 0x180   :  { %v1867_v38 = vcombine.high %v1859_v57, %v1859_v57  ;;  %v2191_v19 = vcombine.low %v1851_v49, %v1859_v57  ;;  %2341 = vst.msk [vmem:[%s3210_s3 + $0x10] sm:$0xff] %vm2338_vm5, %v2012_v28  ;;  %v2014_v60 = vcombine.low %v1679_v43, %v1681_v50  ;;  %v2021_v7 = vrot.slane %v2013_v26, %v2547_v14 }
 0x181   :  { %v1696_v42 = vrot.slane %v1682_v0, %v2547_v14  ;;  %v1697_v29 = vcombine.high %v1689_v13, %v1689_v13  ;;  %v1514_v62 = vpop.f32.mrb[10].mxu0  ;;  %v1868_v39 = vcombine.high %v1866_v16, %v1866_v16  ;;  %v3212_v31 = vcombine.low %v2860_v1, %v2869_v3 }
 0x182   :  { %v2205_v37 = vrot.slane %v2191_v19, %v2547_v14  ;;  %v2207_v48 = vcombine.low %v1867_v38, %v1866_v16  ;;  %v1569_v52 = vpop.f32.mrb[10].mxu1  ;;  %v2028_v11 = vrot.slane %v2014_v60, %v2547_v14  ;;  %v1869_v49 = vcombine.high %v1565_v36, %v1565_v36  ;;  %v2433_v25 = vpop.f32.mrb[11].mxu0 }
 0x183   :  { %v1698_v12 = vcombine.high %v1696_v42, %v1696_v42  ;;  %v1515_v47 = vadd.f32 %v1514_v62, %v3212_v31  ;;  %v2466_v43 = vpop.f32.mrb[11].mxu1  ;;  %v2030_v8 = vcombine.low %v1689_v13, %v1697_v29  ;;  %v1876_v59 = vrot.slane %v1565_v36, %v2547_v14 }
 0x184   :  { %v2206_v45 = vcombine.low %v2198_v6, %v2205_v37  ;;  %v2215_v46 = vrot.slane %v2207_v48, %v2547_v14  ;;  %v2029_v22 = vcombine.low %v2021_v7, %v2028_v11  ;;  %v1883_v1 = vrot.slane %v1869_v49, %v2547_v14 }
 0x185   :  { %v2031_v53 = vcombine.low %v1696_v42, %v1698_v12  ;;  %v1699_v4 = vcombine.high %v1515_v47, %v1515_v47  ;;  %v1706_v34 = vrot.slane %v1515_v47, %v2547_v14  ;;  %v2038_v57 = vrot.slane %v2030_v8, %v2547_v14 }
 0x186   :  { %2354 = vst.msk [vmem:[%s3210_s3 + $0x70] sm:$0xff] %vm2338_vm5, %v2206_v45  ;;  %v1884_v3 = vcombine.high %v1876_v59, %v1876_v59  ;;  %v2208_v6 = vcombine.low %v1868_v39, %v1876_v59  ;;  %2342 = vst.msk [vmem:[%s3210_s3 + $0x18] sm:$0xff] %vm2338_vm5, %v2029_v22  ;;  %v1519_v26 = vpop.f32.mrb[12].mxu0  ;;  %v3213_v0 = vcombine.low %v2877_v20, %v2880_v23 }
 0x187   :  { %v2045_v27 = vrot.slane %v2031_v53, %v2547_v14  ;;  %v1713_v28 = vrot.slane %v1699_v4, %v2547_v14  ;;  %v1714_v50 = vcombine.high %v1706_v34, %v1706_v34  ;;  %v1574_v16 = vpop.f32.mrb[12].mxu1  ;;  %v1520_v60 = vadd.f32 %v1519_v26, %v1125_v18  ;;  %v2436_v42 = vpop.f32.mrb[13].mxu0 }
 0x188   :  { %v1570_v13 = vadd.f32 %v1569_v52, %v3213_v0  ;;  %v2222_v38 = vrot.slane %v2208_v6, %v2547_v14  ;;  %v2224_v19 = vcombine.low %v1884_v3, %v1883_v1  ;;  %v1885_v7 = vcombine.high %v1883_v1, %v1883_v1  ;;  %v2469_v5 = vpop.f32.mrb[13].mxu1 }
 0x189   :  { %v2046_v36 = vcombine.low %v2038_v57, %v2045_v27  ;;  %v1715_v29 = vcombine.high %v1713_v28, %v1713_v28  ;;  %v2047_v37 = vcombine.low %v1706_v34, %v1714_v50  ;;  %v1716_v20 = vcombine.high %v1520_v60, %v1520_v60 }
 0x18a   :  { %v1886_v48 = vcombine.high %v1570_v13, %v1570_v13  ;;  %v2223_v62 = vcombine.low %v2215_v46, %v2222_v38  ;;  %v2232_v39 = vrot.slane %v2224_v19, %v2547_v14  ;;  %v1723_v23 = vrot.slane %v1520_v60, %v2547_v14  ;;  %v1524_v11 = vpop.f32.mrb[14].mxu0 }
 0x18b   :  { %2343 = vst.msk [vmem:[%s3210_s3 + $0x20] sm:$0xff] %vm2338_vm5, %v2046_v36  ;;  %v2048_v17 = vcombine.low %v1713_v28, %v1715_v29  ;;  %v2055_v32 = vrot.slane %v2047_v37, %v2547_v14  ;;  %v1893_v18 = vrot.slane %v1570_v13, %v2547_v14  ;;  %v1579_v12 = vpop.f32.mrb[14].mxu1  ;;  %v1730_v31 = vrot.slane %v1716_v20, %v2547_v14  ;;  %v2439_v45 = vpop.f32.mrb[15].mxu0 }
 0x18c   :  { %v1900_v52 = vrot.slane %v1886_v48, %v2547_v14  ;;  %2355 = vst.msk [vmem:[%s3210_s3 + $0x78] sm:$0xff] %vm2338_vm5, %v2223_v62  ;;  %v1731_v47 = vcombine.high %v1723_v23, %v1723_v23  ;;  %v3214_v49 = vcombine.low %v2896_v40, %v2899_v41  ;;  %v3215_v43 = vcombine.low %v2902_v30, %v2905_v35  ;;  %v2472_v46 = vpop.f32.mrb[15].mxu1 }
 0x18d   :  { %v2062_v59 = vrot.slane %v2048_v17, %v2547_v14  ;;  %v1901_v22 = vcombine.high %v1893_v18, %v1893_v18  ;;  %v2225_v53 = vcombine.low %v1885_v7, %v1893_v18  ;;  %v1732_v34 = vcombine.high %v1730_v31, %v1730_v31 }
 0x18e   :  { %v1525_v25 = vadd.f32 %v1524_v11, %v3214_v49  ;;  %v1575_v8 = vadd.f32 %v1574_v16, %v3215_v43  ;;  %v1902_v4 = vcombine.high %v1900_v52, %v1900_v52  ;;  %v2064_v57 = vcombine.low %v1723_v23, %v1731_v47  ;;  %v1529_v28 = vpop.f32.mrb[16].mxu0 }
 0x18f   :  { %v2063_v6 = vcombine.low %v2055_v32, %v2062_v59  ;;  %v2239_v40 = vrot.slane %v2225_v53, %v2547_v14  ;;  %v2241_v41 = vcombine.low %v1901_v22, %v1900_v52  ;;  %v1584_v30 = vpop.f32.mrb[16].mxu1  ;;  %v2065_v35 = vcombine.low %v1730_v31, %v1732_v34  ;;  %v2442_v13 = vpop.f32.mrb[17].mxu0 }
 0x190   :  { %v1733_v1 = vcombine.high %v1525_v25, %v1525_v25  ;;  %v1740_v3 = vrot.slane %v1525_v25, %v2547_v14  ;;  %v1903_v27 = vcombine.high %v1575_v8, %v1575_v8  ;;  %v2072_v50 = vrot.slane %v2064_v57, %v2547_v14  ;;  %v2475_v16 = vpop.f32.mrb[17].mxu1 }
 0x191   :  { %2344 = vst.msk [vmem:[%s3210_s3 + $0x28] sm:$0xff] %vm2338_vm5, %v2063_v6  ;;  %v2240_v38 = vcombine.low %v2232_v39, %v2239_v40  ;;  %v2249_v19 = vrot.slane %v2241_v41, %v2547_v14  ;;  %v1910_v60 = vrot.slane %v1575_v8, %v2547_v14  ;;  %v2079_v42 = vrot.slane %v2065_v35, %v2547_v14 }
 0x192   :  { %v1747_v26 = vrot.slane %v1733_v1, %v2547_v14  ;;  %v1748_v0 = vcombine.high %v1740_v3, %v1740_v3  ;;  %v1917_v7 = vrot.slane %v1903_v27, %v2547_v14  ;;  %v1530_v29 = vadd.f32 %v1529_v28, %v1159_v54  ;;  %v1534_v23 = vpop.f32.mrb[18].mxu0 }
 0x193   :  { %2356 = vst.msk [vmem:[%s3210_s3 + $0x80] sm:$0xff] %vm2338_vm5, %v2240_v38  ;;  %v1918_v37 = vcombine.high %v1910_v60, %v1910_v60  ;;  %v2242_v48 = vcombine.low %v1902_v4, %v1910_v60  ;;  %v3216_v62 = vcombine.low %v2914_v61, %v2917_v2  ;;  %v1589_v17 = vpop.f32.mrb[18].mxu1  ;;  %v2080_v32 = vcombine.low %v2072_v50, %v2079_v42  ;;  %v2445_v56 = vpop.f32.mrb[19].mxu0 }
 0x194   :  { %v1749_v5 = vcombine.high %v1747_v26, %v1747_v26  ;;  %v2081_v36 = vcombine.low %v1740_v3, %v1748_v0  ;;  %v1919_v20 = vcombine.high %v1917_v7, %v1917_v7  ;;  %v1750_v10 = vcombine.high %v1530_v29, %v1530_v29  ;;  %v2478_v54 = vpop.f32.mrb[19].mxu1 }
 0x195   :  { %v1580_v39 = vadd.f32 %v1579_v12, %v3216_v62  ;;  %v2256_v11 = vrot.slane %v2242_v48, %v2547_v14  ;;  %v2258_v31 = vcombine.low %v1918_v37, %v1917_v7  ;;  %v1757_v47 = vrot.slane %v1530_v29, %v2547_v14  ;;  %2345 = vst.msk [vmem:[%s3210_s3 + $0x30] sm:$0xff] %vm2338_vm5, %v2080_v32 }
 0x196   :  { %v2082_v18 = vcombine.low %v1747_v26, %v1749_v5  ;;  %v2089_v52 = vrot.slane %v2081_v36, %v2547_v14  ;;  %v1764_v2 = vrot.slane %v1750_v10, %v2547_v14  ;;  %v1535_v25 = vadd.f32 %v1534_v23, %v1176_v9  ;;  %v1539_v59 = vpop.f32.mrb[20].mxu0 }
 0x197   :  { %v1920_v49 = vcombine.high %v1580_v39, %v1580_v39  ;;  %v1927_v12 = vrot.slane %v1580_v39, %v2547_v14  ;;  %v2257_v43 = vcombine.low %v2249_v19, %v2256_v11  ;;  %v2266_v8 = vrot.slane %v2258_v31, %v2547_v14  ;;  %v2448_v57 = vpop.f32.mrb[21].mxu0 }
 0x198   :  { %v2096_v61 = vrot.slane %v2082_v18, %v2547_v14  ;;  %v1765_v45 = vcombine.high %v1757_v47, %v1757_v47  ;;  %v1766_v53 = vcombine.high %v1764_v2, %v1764_v2  ;;  %v1767_v51 = vcombine.high %v1535_v25, %v1535_v25 }
 0x199   :  { %v1934_v46 = vrot.slane %v1920_v49, %v2547_v14  ;;  %v1935_v4 = vcombine.high %v1927_v12, %v1927_v12  ;;  %v2259_v34 = vcombine.low %v1919_v20, %v1927_v12  ;;  %2357 = vst.msk [vmem:[%s3210_s3 + $0x88] sm:$0xff] %vm2338_vm5, %v2257_v43  ;;  %v1774_v55 = vrot.slane %v1535_v25, %v2547_v14 }
 0x19a   :  { %v2097_v22 = vcombine.low %v2089_v52, %v2096_v61  ;;  %v2098_v1 = vcombine.low %v1757_v47, %v1765_v45  ;;  %v1585_v9 = vadd.f32 %v1584_v30, %v1346_v15  ;;  %v2099_v3 = vcombine.low %v1764_v2, %v1766_v53 }
 0x19b   :  { %v2273_v6 = vrot.slane %v2259_v34, %v2547_v14  ;;  %v2275_v40 = vcombine.low %v1935_v4, %v1934_v46  ;;  %v1936_v41 = vcombine.high %v1934_v46, %v1934_v46  ;;  %v1781_v28 = vrot.slane %v1767_v51, %v2547_v14 }
 0x19c   :  { %2346 = vst.msk [vmem:[%s3210_s3 + $0x38] sm:$0xff] %vm2338_vm5, %v2097_v22  ;;  %v2106_v27 = vrot.slane %v2098_v1, %v2547_v14  ;;  %v1782_v35 = vcombine.high %v1774_v55, %v1774_v55  ;;  %v1937_v50 = vcombine.high %v1585_v9, %v1585_v9  ;;  %v2113_v26 = vrot.slane %v2099_v3, %v2547_v14 }
 0x19d   :  { %v2274_v44 = vcombine.low %v2266_v8, %v2273_v6  ;;  %v2283_v63 = vrot.slane %v2275_v40, %v2547_v14  ;;  %v1944_v15 = vrot.slane %v1585_v9, %v2547_v14  ;;  %v1783_v30 = vcombine.high %v1781_v28, %v1781_v28 }
 0x19e   :  { %v2115_v0 = vcombine.low %v1774_v55, %v1782_v35  ;;  %v1951_v13 = vrot.slane %v1937_v50, %v2547_v14  ;;  %v1590_v16 = vadd.f32 %v1589_v17, %v2999_v33  ;;  %v2114_v38 = vcombine.low %v2106_v27, %v2113_v26 }
 0x19f   :  { %2358 = vst.msk [vmem:[%s3210_s3 + $0x90] sm:$0xff] %vm2338_vm5, %v2274_v44  ;;  %v1952_v19 = vcombine.high %v1944_v15, %v1944_v15  ;;  %v2276_v60 = vcombine.low %v1936_v41, %v1944_v15  ;;  %v3217_v7 = vcombine.low %v2981_v21, %v2984_v24  ;;  %v2116_v5 = vcombine.low %v1781_v28, %v1783_v30 }
 0x1a0   :  { %v1953_v36 = vcombine.high %v1951_v13, %v1951_v13  ;;  %v1960_v29 = vrot.slane %v1590_v16, %v2547_v14  ;;  %2347 = vst.msk [vmem:[%s3210_s3 + $0x40] sm:$0xff] %vm2338_vm5, %v2114_v38  ;;  %v2123_v39 = vrot.slane %v2115_v0, %v2547_v14 }
 0x1a1   :  { %v1540_v42 = vadd.f32 %v1539_v59, %v3217_v7  ;;  %v2290_v33 = vrot.slane %v2276_v60, %v2547_v14  ;;  %v2292_v37 = vcombine.low %v1952_v19, %v1951_v13  ;;  %v2130_v21 = vrot.slane %v2116_v5, %v2547_v14 }
 0x1a2   :  { %v1961_v24 = vcombine.high %v1960_v29, %v1960_v29  ;;  %v2293_v20 = vcombine.low %v1953_v36, %v1960_v29 }
 0x1a3   :  { %v1784_v48 = vcombine.high %v1540_v42, %v1540_v42  ;;  %v1791_v62 = vrot.slane %v1540_v42, %v2547_v14  ;;  %v2291_v23 = vcombine.low %v2283_v63, %v2290_v33  ;;  %v2300_v17 = vrot.slane %v2292_v37, %v2547_v14 }
 0x1a4   :  { %v2131_v52 = vcombine.low %v2123_v39, %v2130_v21  ;;  %v2307_v10 = vrot.slane %v2293_v20, %v2547_v14  ;;  %v2315_v56 = vrot.slane %v1961_v24, %v2547_v14 }
 0x1a5   :  { %v1798_v32 = vrot.slane %v1784_v48, %v2547_v14  ;;  %v1799_v18 = vcombine.high %v1791_v62, %v1791_v62  ;;  %v2138_v54 = vrot.slane %v1791_v62, %v2547_v14  ;;  %2359 = vst.msk [vmem:[%s3210_s3 + $0x98] sm:$0xff] %vm2338_vm5, %v2291_v23 }
 0x1a6   :  { %2348 = vst.msk [vmem:[%s3210_s3 + $0x48] sm:$0xff] %vm2338_vm5, %v2131_v52  ;;  %v2308_v47 = vcombine.low %v2300_v17, %v2307_v10 }
 0x1a7   :  { %v1800_v11 = vcombine.high %v1798_v32, %v1798_v32  ;;  %v2139_v31 = vcombine.low %v1799_v18, %v1798_v32  ;;  %2361 = vst.msk [vmem:[%s3210_s3 + $0xa8] sm:$0x3] %vm2349_vm6, %v2315_v56  ;;  %2350 = vst.msk [vmem:[%s3210_s3 + $0x50] sm:$0x3] %vm2349_vm6, %v2138_v54 }
 0x1a8   :  { %2360 = vst.msk [vmem:[%s3210_s3 + $0xa0] sm:$0xff] %vm2338_vm5, %v2308_v47 }
 0x1a9   :  { %v2140_v49 = vcombine.low %v1800_v11, %v2942_v58  ;;  %v2147_v61 = vrot.slane %v2139_v31, %v2547_v14 }
 0x1ab   :  { %v2154_v2 = vrot.slane %v2140_v49, %v2547_v14 }
 0x1ad   :  { %v2155_v12 = vcombine.low %v2147_v61, %v2154_v2 }
 0x1af   :  { %2351 = vst.msk [vmem:[%s3210_s3 + $0x58] sm:$0xff] %vm2338_vm5, %v2155_v12 }

</bundles_post_ra>
